<compile_context>
chip_gen: v7x
topology: tpu7x:2x2x1
jax: 0.10.0
libtpu: 0.0.40
codegen_flags: <defaults>
</compile_context>

<pallas_src>
import numpy as np

import jax
import jax.numpy as jnp
from jax.experimental import pallas as pl
from jax.experimental.pallas import tpu as pltpu


_RHS = (12, 64)  # the constant tuple appended by the original module


# ----------------------------------------------------------------------------
# Minimal Pallas kernel (verification path only — NOT on the forward hot path)
# ----------------------------------------------------------------------------
def _tuple_concat_kernel(a_ref, b_ref, o_ref):
    # a_ref: (2,) int32 in SMEM, b_ref: (2,) int32 in SMEM, o_ref: (4,) int32 in SMEM
    # Four scalar stores — the minimal scalar-slot codegen for this op.
    o_ref[0] = a_ref[0]
    o_ref[1] = a_ref[1]
    o_ref[2] = b_ref[0]
    o_ref[3] = b_ref[1]


@jax.jit
def tuple_concat_pallas(a: jax.Array, b: jax.Array) -> jax.Array:
    """Concatenate two length-2 int32 vectors into a length-4 int32 vector."""
    return pl.pallas_call(
        _tuple_concat_kernel,
        out_shape=jax.ShapeDtypeStruct((4,), jnp.int32),
        in_specs=[
            pl.BlockSpec(memory_space=pltpu.SMEM),
            pl.BlockSpec(memory_space=pltpu.SMEM),
        ],
        out_specs=pl.BlockSpec(memory_space=pltpu.SMEM),
    )(a, b)


# ----------------------------------------------------------------------------
# Module
# ----------------------------------------------------------------------------
class M:
    """JAX equivalent of the PyTorch module M (tuple concatenation).

    The forward is pure Python — no kernel launch, no device transfers —
    which is the fastest possible implementation of operator.add on tuples.
    """

    def forward(self, x410: tuple) -> tuple:
        return tuple(x410) + _RHS


if __name__ == "__main__":
    # Deterministic "input" — the module's forward takes a constant tuple.
    # (PRNGKey included per harness convention; no random tensors are needed.)
    _ = jax.random.PRNGKey(0)

    x410 = (1, 384)
    expected = (1, 384, 12, 64)  # operator.add((1, 384), (12, 64))

    # Hot path: pure Python, matches the original module's semantics exactly.
    m = M()
    x411 = m.forward(x410)
    assert x411 == expected, f"got {x411}, expected {expected}"

    # One-shot Pallas verification (kernel launched once, single bulk readback).
    lhs = jnp.asarray(x410, dtype=jnp.int32)
    rhs = jnp.asarray(_RHS, dtype=jnp.int32)
    out = tuple_concat_pallas(lhs, rhs)
    out = jax.block_until_ready(out)
    kernel_result = tuple(np.asarray(out).tolist())  # one D2H transfer
    assert kernel_result == expected, f"kernel got {kernel_result}, expected {expected}"

    print("KERNEL_OK")
</pallas_src>

<mosaic_0001>
module attributes {stable_mosaic.version = 11 : i64} {
  func.func @_tuple_concat_kernel(%arg0: memref<2xi32, #tpu.memory_space<smem>>, %arg1: memref<2xi32, #tpu.memory_space<smem>>, %arg2: memref<4xi32, #tpu.memory_space<smem>>) attributes {dimension_semantics = [], scalar_prefetch = 0 : i64, scratch_operands = 0 : i64, tpu.core_type = #tpu.core_type<tc>} {
    %c0 = arith.constant 0 : index
    %0 = memref.load %arg0[%c0] : memref<2xi32, #tpu.memory_space<smem>>
    %c0_0 = arith.constant 0 : index
    %1 = memref.load %arg2[%c0_0] : memref<4xi32, #tpu.memory_space<smem>>
    memref.store %0, %arg2[%c0_0] : memref<4xi32, #tpu.memory_space<smem>>
    %c1 = arith.constant 1 : index
    %2 = memref.load %arg0[%c1] : memref<2xi32, #tpu.memory_space<smem>>
    %c1_1 = arith.constant 1 : index
    %3 = memref.load %arg2[%c1_1] : memref<4xi32, #tpu.memory_space<smem>>
    memref.store %2, %arg2[%c1_1] : memref<4xi32, #tpu.memory_space<smem>>
    %c0_2 = arith.constant 0 : index
    %4 = memref.load %arg1[%c0_2] : memref<2xi32, #tpu.memory_space<smem>>
    %c2 = arith.constant 2 : index
    %5 = memref.load %arg2[%c2] : memref<4xi32, #tpu.memory_space<smem>>
    memref.store %4, %arg2[%c2] : memref<4xi32, #tpu.memory_space<smem>>
    %c1_3 = arith.constant 1 : index
    %6 = memref.load %arg1[%c1_3] : memref<2xi32, #tpu.memory_space<smem>>
    %c3 = arith.constant 3 : index
    %7 = memref.load %arg2[%c3] : memref<4xi32, #tpu.memory_space<smem>>
    memref.store %6, %arg2[%c3] : memref<4xi32, #tpu.memory_space<smem>>
    return
  }
}

</mosaic_0001>

<bundles_post_ra>
// kernel: tuple_concat_pallas.1
= control target key start
LH: loop header
LB: loop body
LE: loop exit
PB: predicated region body
PF: predicated region fallthrough
CT: control target
= control target key end

     0   :  { %7 = vsyncpa [#allocation3], 0  ;;  %s150_s0 = inlined_call_operand.hbm [shape: s32[2], index: 0, kind: input, shape index: {}]   ;;  %s151_s1 = inlined_call_operand.vmem [shape: s32[2], index: 1, kind: input, shape index: {}]   ;;  %s152_s2 = inlined_call_operand.hbm [shape: s32[4], index: 2, kind: output, shape index: {}]  }
   0x1   :  { %8 = vsyncpa [#allocation5], 0 }
   0x2   :  { %9 = vsyncpa [#allocation4], 0  ;;  %s24_s11 = sshll.u32 %s151_s1, 4  ;;  %s67_s14 = scalar_lea.hbm %s150_s0, 16  ;;  %s25_s11 = int_to_ptr.vmem [resolvable:$true] %s24_s11 }
   0x3   :  { %p68_p0 = scmp.ne.s32.totalorder %s150_s0, %s67_s14  ;;  %p71_p1 = scmp.lt.u32.totalorder %s67_s14, %s150_s0 }
   0x5   :  { %p73_p2 = pnand %p71_p1, %p68_p0 }
   0x7   :  { %76 = shalt.err (!%p73_p2)
}
   0x8   :  { %s105_s19 = smov [#allocation2]   ;;  %s77_s1 = scalar_lea.vmem %s25_s11, 16 }
   0x9   :  { %17 = dma.hbm_to_smem %s150_s0, 16, %s105_s19, [#allocation3]  }
   0xa   :  { %p78_p3 = scmp.ne.s32.totalorder %s25_s11, %s77_s1  ;;  %p82_p4 = scmp.lt.s32.totalorder %s25_s11, %s25_s11 }
   0xb   :  { %p83_p5 = scmp.lt.s32.totalorder %s77_s1, %s77_s1 }
   0xd   :  { %p84_p6 = por %p83_p5, %p82_p4 }
   0xf   :  { %p85_p7 = pnand %p84_p6, %p78_p3 }
  0x11   :  { %88 = shalt.err (!%p85_p7)
}
  0x12   :  { %s106_s22 = smov [#allocation6]  }
  0x13   :  { %27 = dma.vmem_to_smem %s25_s11, 16, %s106_s22, [#allocation5]  }
  0x14   :  { %99 = dma.done.wait [#allocation3], 16  }
  0x15   :  { %100 = vsyncadd [#allocation3], 4294967280 }
  0x16   :  { %101 = dma.done.wait [#allocation5], 16  }
  0x17   :  { %102 = vsyncadd [#allocation5], 4294967280 }
  0x18   :  { %34 = sfence }
  0x19   :  { %s35_s23 = sld [smem:[#allocation2]]  ;;  %s62_s24 = sld [smem:[#allocation2 + $0x1]] }
  0x1a   :  { %s41_s25 = sld [smem:[#allocation6]]  ;;  %s63_s26 = sld [smem:[#allocation6 + $0x1]] }
  0x1b   :  { %s89_s28 = scalar_lea.hbm %s152_s2, 16 }
  0x1c   :  { %p90_p8 = scmp.ne.s32.totalorder %s152_s2, %s89_s28  ;;  %p93_p9 = scmp.lt.u32.totalorder %s89_s28, %s152_s2 }
  0x1e   :  { %p95_p10 = pnand %p93_p9, %p90_p8 }
  0x1f   :  { %37 = sst [smem:[#allocation7]] %s35_s23 }
  0x20   :  { %40 = sst [smem:[#allocation7 + $0x1]] %s62_s24 }
  0x21   :  { %43 = sst [smem:[#allocation7 + $0x2]] %s41_s25 }
  0x22   :  { %46 = sst [smem:[#allocation7 + $0x3]] %s63_s26 }
  0x23   :  { %98 = shalt.err (!%p95_p10)
}
  0x24   :  { %s107_s5 = smov [#allocation7]  }
  0x25   :  { %54 = dma.smem_to_hbm %s107_s5, 16, %s152_s2, [#allocation4]  }
  0x26   :  { %103 = dma.done.wait [#allocation4], 16  }
  0x27   :  { %104 = vsyncadd [#allocation4], 4294967280 }
  0x28   :  { %58 = sfence }
  0x29   :  { %59 = vsyncpa [#allocation3], 1 }
  0x2a   :  { %60 = vsyncpa [#allocation4], 1 }
  0x2b   :  { %61 = vsyncpa [#allocation5], 1 }

</bundles_post_ra>
